<compile_context>
chip_gen: v6e
topology: v6e:2x2x1
jax: 0.10.0
libtpu: 0.0.40
codegen_flags: <defaults>
</compile_context>

<pallas_src>
import functools

import jax
import jax.numpy as jnp
from jax.experimental import pallas as pl
from jax.experimental.pallas import tpu as pltpu


def _decode_kernel(loc_ref, prior_ref, boxes_ref, *, v0, v1):
    # Planar refs, priors on the 128-lane (last) axis:
    #   loc_ref   : (8, tp)  rows 0:4 = ARM loc deltas, rows 4:8 = ODM loc deltas
    #   prior_ref : (4, tp)  priors in center-size form (cx, cy, w, h)
    #   boxes_ref : (4, tp)  decoded corner boxes (xmin, ymin, xmax, ymax)
    lp = loc_ref[...].astype(jnp.float32)
    pr = prior_ref[...].astype(jnp.float32)

    al = lp[0:4, :]          # arm_loc
    ol = lp[4:8, :]          # odm_loc
    pxy, pwh = pr[0:2, :], pr[2:4, :]

    # ---- Stage 1: batch_decode(arm_loc, priors) -> corner boxes ----
    cxy1 = pxy + al[0:2, :] * v0 * pwh
    wh1 = pwh * jnp.exp(al[2:4, :] * v1)        # exp -> EUP slot
    xymin1 = cxy1 - wh1 * 0.5
    xymax1 = wh1 + xymin1

    # ---- batch_center_size -> refined anchors (cx, cy, w, h) ----
    dxy = (xymax1 + xymin1) * 0.5
    dwh = xymax1 - xymin1

    # ---- Stage 2: batch_decode(odm_loc, refined anchors) ----
    cxy2 = dxy + ol[0:2, :] * v0 * dwh
    wh2 = dwh * jnp.exp(ol[2:4, :] * v1)
    xymin2 = cxy2 - wh2 * 0.5
    xymax2 = wh2 + xymin2

    # Single full-ref (unmasked, lane-dense) store.
    boxes_ref[...] = jnp.concatenate([xymin2, xymax2], axis=0).astype(boxes_ref.dtype)


def _choose_lane_tile(P, N, tile_p):
    """Largest lane tile that (a) respects tile_p and (b) gives >=2 parallel
    grid iterations when N == 1 so both v7x TensorCores get work."""
    if P <= 128:
        return P
    if N == 1:
        half = ((P + 1) // 2 + 127) // 128 * 128    # multiple of 128
        return min(tile_p, half, ((P + 127) // 128) * 128 if half >= P else half)
    return P if P <= tile_p else tile_p


def detect_refinedet(arm_loc, arm_conf, odm_loc, odm_conf, prior_data, *,
                     num_classes, variance=(0.1, 0.2), tile_p=32768,
                     planar_boxes=False):
    """Forward pass of Detect_RefineDet with export_tensorrt_onnx=True.

    arm_loc:   (N, P, 4)     odm_loc:  (N, P, 4)
    arm_conf:  (N, P, 2)     odm_conf: (N, P, C) (or flat, reshaped here)
    prior_data:(P, 4)
    Returns (decoded_boxes (N, P, 4) [or (N, 4, P) if planar_boxes],
             probs (N, C-1, P)).
    """
    # TODO(synk): arm_conf (ARM objectness thresholding) is unused in the
    # export_tensorrt_onnx=True forward path of the reference module.
    del arm_conf
    N, P, _ = arm_loc.shape
    C = num_classes

    # probs is a pure slice+transpose -> keep it out of the kernel entirely
    # (slice BEFORE the transpose so only the foreground classes are moved).
    conf = odm_conf.reshape(N, P, C)
    probs = jnp.transpose(conf[:, :, 1:], (0, 2, 1))            # (N, C-1, P)

    # Pack ARM + ODM deltas into one planar (component-major) stream so the
    # prior axis lands on the 128-lane axis and all 8 sublanes are used.
    # TODO(synk): have the detection heads emit this planar layout directly
    # to remove these XLA transpose passes altogether.
    loc_pk = jnp.transpose(jnp.concatenate([arm_loc, odm_loc], axis=2),
                           (0, 2, 1))                           # (N, 8, P)
    pri_t = jnp.transpose(prior_data, (1, 0))                   # (4, P)

    tp = _choose_lane_tile(P, N, tile_p)
    grid = (pl.cdiv(P, tp), N)   # prior tiles outer, batch inner -> prior tile
                                 # keeps the same block index across the batch
                                 # and is not re-fetched from HBM.

    # VMEM budget: only raise the scoped limit when the double-buffered blocks
    # actually need it (keeps v5e 16 MiB / v7x 32 MiB defaults happy otherwise).
    itemsize = jnp.dtype(odm_loc.dtype).itemsize
    step_bytes = (8 * itemsize + 4 * jnp.dtype(prior_data.dtype).itemsize
                  + 4 * itemsize) * tp
    vmem_need = 2 * step_bytes + (2 << 20)
    vmem_limit = int(vmem_need) if vmem_need > (12 << 20) else None

    kernel = functools.partial(
        _decode_kernel, v0=float(variance[0]), v1=float(variance[1]))

    boxes_t = pl.pallas_call(
        kernel,
        out_shape=jax.ShapeDtypeStruct((N, 4, P), odm_loc.dtype),
        grid_spec=pltpu.PrefetchScalarGridSpec(
            num_scalar_prefetch=0,
            grid=grid,
            in_specs=[
                pl.BlockSpec((None, 8, tp), lambda p, b: (b, 0, p)),  # arm+odm loc
                pl.BlockSpec((4, tp), lambda p, b: (0, p)),           # priors (shared)
            ],
            out_specs=pl.BlockSpec((None, 4, tp), lambda p, b: (b, 0, p)),
        ),
        compiler_params=pltpu.CompilerParams(
            dimension_semantics=("parallel", "parallel"),
            vmem_limit_bytes=vmem_limit),
    )(loc_pk, pri_t)

    if planar_boxes:
        return boxes_t, probs                                    # (N, 4, P)
    decoded_boxes = jnp.transpose(boxes_t, (0, 2, 1))            # (N, P, 4)
    return decoded_boxes, probs


if __name__ == "__main__":
    # Module config: Detect_RefineDet(num_classes=2, size=320, ...)
    num_classes = 2
    variance = (0.1, 0.2)   # voc_refinedet['320']['variance']
    # TODO(synk): top_k / conf_thresh / nms_thresh / objectness_thre / keep_top_k
    # are unused in the export_tensorrt_onnx=True forward path (no NMS here).

    # --- Pure-JAX reference mirroring the PyTorch forward exactly ---
    def batch_decode_ref(loc, pri, v):
        b = jnp.concatenate(
            (pri[:, :, :2] + loc[:, :, :2] * v[0] * pri[:, :, 2:],
             pri[:, :, 2:] * jnp.exp(loc[:, :, 2:] * v[1])), axis=2)
        x2 = b[:, :, :2] - b[:, :, 2:] * 0.5
        y2 = b[:, :, 2:] + x2
        return jnp.concatenate((x2, y2), axis=2)

    def batch_center_size_ref(b):
        return jnp.concatenate(
            [(b[:, :, 2:] + b[:, :, :2]) / 2, b[:, :, 2:] - b[:, :, :2]], axis=2)

    def run_case(seed, N, P):
        key = jax.random.PRNGKey(seed)
        k1, k2, k3, k4, k5, k6 = jax.random.split(key, 6)
        arm_loc = jax.random.normal(k1, (N, P, 4), jnp.float32) * 0.5
        arm_conf = jax.random.normal(k2, (N, P, 2), jnp.float32)  # unused here
        odm_loc = jax.random.normal(k3, (N, P, 4), jnp.float32) * 0.5
        odm_conf = jax.nn.softmax(
            jax.random.normal(k4, (N, P, num_classes), jnp.float32), axis=-1)
        pr_cxy = jax.random.uniform(k5, (P, 2), jnp.float32, minval=0.05, maxval=0.95)
        pr_wh = jax.random.uniform(k6, (P, 2), jnp.float32, minval=0.05, maxval=0.40)
        priors = jnp.concatenate([pr_cxy, pr_wh], axis=1)         # (P, 4)

        boxes, probs = detect_refinedet(
            arm_loc, arm_conf, odm_loc, odm_conf, priors,
            num_classes=num_classes, variance=variance)
        boxes, probs = jax.block_until_ready((boxes, probs))

        pri_b = jnp.broadcast_to(priors[None], (N, P, 4))
        default = batch_center_size_ref(batch_decode_ref(arm_loc, pri_b, variance))
        boxes_ref = batch_decode_ref(odm_loc, default, variance)
        probs_ref = jnp.transpose(odm_conf, (0, 2, 1))[:, 1:, :]

        assert boxes.shape == (N, P, 4) and boxes.dtype == odm_loc.dtype
        assert probs.shape == (N, num_classes - 1, P) and probs.dtype == odm_conf.dtype
        assert jnp.allclose(boxes, boxes_ref, atol=1e-5, rtol=1e-5)
        assert jnp.allclose(probs, probs_ref, atol=1e-6, rtol=1e-6)

    # batch=2 case (single full-P lane tile, priors reused across batch)
    run_case(0, N=2, P=512)
    # batch=1 case with P not a multiple of 128 (exercises the >=2 parallel
    # prior-tile split for v7x and Pallas masking of the partial last block)
    run_case(1, N=1, P=300)

    print("KERNEL_OK")
</pallas_src>

<mosaic_0001>
module attributes {stable_mosaic.version = 11 : i64} {
  func.func @_decode_kernel(%arg0: i32, %arg1: i32, %arg2: memref<1x8x512xf32, #tpu.memory_space<vmem>>, %arg3: memref<4x512xf32, #tpu.memory_space<vmem>>, %arg4: memref<1x4x512xf32, #tpu.memory_space<vmem>>) attributes {dimension_semantics = [#tpu.dimension_semantics<parallel>, #tpu.dimension_semantics<parallel>], iteration_bounds = array<i64: 1, 2>, scalar_prefetch = 0 : i64, scratch_operands = 0 : i64, tpu.core_type = #tpu.core_type<tc>, window_params = [{transform_indices = @transform_0, window_bounds = array<i64: 1, 8, 512>}, {transform_indices = @transform_1, window_bounds = array<i64: 4, 512>}, {transform_indices = @transform_2, window_bounds = array<i64: 1, 4, 512>}]} {
    %c0 = arith.constant 0 : index
    %c0_0 = arith.constant 0 : index
    %c0_1 = arith.constant 0 : index
    %0 = vector.load %arg2[%c0, %c0_0, %c0_1] : memref<1x8x512xf32, #tpu.memory_space<vmem>>, vector<1x8x512xf32>
    %1 = vector.shape_cast %0 : vector<1x8x512xf32> to vector<8x512xf32>
    %c0_2 = arith.constant 0 : index
    %c0_3 = arith.constant 0 : index
    %2 = vector.load %arg3[%c0_2, %c0_3] : memref<4x512xf32, #tpu.memory_space<vmem>>, vector<4x512xf32>
    %3 = vector.extract_strided_slice %1 {offsets = [0, 0], sizes = [4, 512], strides = [1, 1]} : vector<8x512xf32> to vector<4x512xf32>
    %4 = vector.extract_strided_slice %1 {offsets = [4, 0], sizes = [4, 512], strides = [1, 1]} : vector<8x512xf32> to vector<4x512xf32>
    %5 = vector.extract_strided_slice %2 {offsets = [0, 0], sizes = [2, 512], strides = [1, 1]} : vector<4x512xf32> to vector<2x512xf32>
    %6 = vector.extract_strided_slice %2 {offsets = [2, 0], sizes = [2, 512], strides = [1, 1]} : vector<4x512xf32> to vector<2x512xf32>
    %7 = vector.extract_strided_slice %3 {offsets = [0, 0], sizes = [2, 512], strides = [1, 1]} : vector<4x512xf32> to vector<2x512xf32>
    %cst = arith.constant 1.000000e-01 : f32
    %8 = vector.broadcast %cst : f32 to vector<2x512xf32>
    %9 = arith.mulf %7, %8 : vector<2x512xf32>
    %10 = arith.mulf %9, %6 : vector<2x512xf32>
    %11 = arith.addf %5, %10 : vector<2x512xf32>
    %12 = vector.extract_strided_slice %3 {offsets = [2, 0], sizes = [2, 512], strides = [1, 1]} : vector<4x512xf32> to vector<2x512xf32>
    %cst_4 = arith.constant 2.000000e-01 : f32
    %13 = vector.broadcast %cst_4 : f32 to vector<2x512xf32>
    %14 = arith.mulf %12, %13 : vector<2x512xf32>
    %15 = math.exp %14 : vector<2x512xf32>
    %16 = arith.mulf %6, %15 : vector<2x512xf32>
    %cst_5 = arith.constant 5.000000e-01 : f32
    %17 = vector.broadcast %cst_5 : f32 to vector<2x512xf32>
    %18 = arith.mulf %16, %17 : vector<2x512xf32>
    %19 = arith.subf %11, %18 : vector<2x512xf32>
    %20 = arith.addf %16, %19 : vector<2x512xf32>
    %21 = arith.addf %20, %19 : vector<2x512xf32>
    %cst_6 = arith.constant 5.000000e-01 : f32
    %22 = vector.broadcast %cst_6 : f32 to vector<2x512xf32>
    %23 = arith.mulf %21, %22 : vector<2x512xf32>
    %24 = arith.subf %20, %19 : vector<2x512xf32>
    %25 = vector.extract_strided_slice %4 {offsets = [0, 0], sizes = [2, 512], strides = [1, 1]} : vector<4x512xf32> to vector<2x512xf32>
    %cst_7 = arith.constant 1.000000e-01 : f32
    %26 = vector.broadcast %cst_7 : f32 to vector<2x512xf32>
    %27 = arith.mulf %25, %26 : vector<2x512xf32>
    %28 = arith.mulf %27, %24 : vector<2x512xf32>
    %29 = arith.addf %23, %28 : vector<2x512xf32>
    %30 = vector.extract_strided_slice %4 {offsets = [2, 0], sizes = [2, 512], strides = [1, 1]} : vector<4x512xf32> to vector<2x512xf32>
    %cst_8 = arith.constant 2.000000e-01 : f32
    %31 = vector.broadcast %cst_8 : f32 to vector<2x512xf32>
    %32 = arith.mulf %30, %31 : vector<2x512xf32>
    %33 = math.exp %32 : vector<2x512xf32>
    %34 = arith.mulf %24, %33 : vector<2x512xf32>
    %cst_9 = arith.constant 5.000000e-01 : f32
    %35 = vector.broadcast %cst_9 : f32 to vector<2x512xf32>
    %36 = arith.mulf %34, %35 : vector<2x512xf32>
    %37 = arith.subf %29, %36 : vector<2x512xf32>
    %38 = arith.addf %34, %37 : vector<2x512xf32>
    %39 = tpu.concatenate %37, %38 in 0 : vector<2x512xf32>, vector<2x512xf32> -> vector<4x512xf32>
    %c0_10 = arith.constant 0 : index
    %c0_11 = arith.constant 0 : index
    %c0_12 = arith.constant 0 : index
    %40 = vector.load %arg4[%c0_10, %c0_11, %c0_12] : memref<1x4x512xf32, #tpu.memory_space<vmem>>, vector<1x4x512xf32>
    %41 = vector.shape_cast %40 : vector<1x4x512xf32> to vector<4x512xf32>
    %42 = vector.shape_cast %39 : vector<4x512xf32> to vector<1x4x512xf32>
    tpu.vector_store %arg4[%c0_10, %c0_11, %c0_12], %42 {strides = array<i32>} : memref<1x4x512xf32, #tpu.memory_space<vmem>>, vector<1x4x512xf32>,
    return
  }
  func.func @transform_0(%arg0: i32, %arg1: i32) -> (i32, i32, i32) {
    %c0_i32 = arith.constant 0 : i32
    %c0_i32_0 = arith.constant 0 : i32
    return %arg1, %c0_i32, %arg0 : i32, i32, i32
  }
  func.func @transform_1(%arg0: i32, %arg1: i32) -> (i32, i32) {
    %c0_i32 = arith.constant 0 : i32
    %c0_i32_0 = arith.constant 0 : i32
    return %c0_i32, %arg0 : i32, i32
  }
  func.func @transform_2(%arg0: i32, %arg1: i32) -> (i32, i32, i32) {
    %c0_i32 = arith.constant 0 : i32
    %c0_i32_0 = arith.constant 0 : i32
    return %arg1, %c0_i32, %arg0 : i32, i32, i32
  }
}

</mosaic_0001>

<bundles_post_ra>
// kernel: tpu_custom_call.1
= control target key start
LH: loop header
LB: loop body
LE: loop exit
PB: predicated region body
PF: predicated region fallthrough
CT: control target
= control target key end

     0   :  { %7 = vsyncpa [#allocation3], 0  ;;  %s906_s0 = inlined_call_operand.hbm [shape: f32[2,8,512], index: 0, kind: input, shape index: {}]   ;;  %s907_s1 = inlined_call_operand.hbm [shape: f32[4,512], index: 1, kind: input, shape index: {}]   ;;  %s908_s2 = inlined_call_operand.hbm [shape: f32[2,4,512], index: 2, kind: output, shape index: {}]  }
   0x1   :  { %9 = vsyncpa [#allocation3 + $0x1], 0 }
   0x2   :  { %10 = vsyncpa [#allocation6], 0 }
   0x3   :  { %11 = vsyncpa [#allocation4], 0 }
   0x4   :  { %13 = vsyncpa [#allocation4 + $0x1], 0  ;;  %s734_s9 = smov 0   ;;  %s736_s10 = smov 0  }
   0x5   :  { %s738_s11 = smov 0   ;;  %s740_s12 = smov 0  }
   0x6   :  { %s742_s13 = smov 0   ;;  %s744_s14 = smov 0  }
   0x7 LB: > { %s472_s15 = sadd.s32 4294967295, %s714_s14   ;;  %s473_s16 = sadd.s32 4294967294, %s714_s14   ;;  %s714_s14 = sphi %s744_s14, %s19_s14   ;;  %s710_s13 = sphi %s742_s13, %s925_s13   ;;  %s706_s12 = sphi %s740_s12, %s924_s12   ;;  %s702_s11 = sphi %s738_s11, %s923_s11   ;;  %s698_s10 = sphi %s736_s10, %s922_s10   ;;  %s694_s9 = sphi %s734_s9, %s921_s9  }
   0x8   : > { %p53_p0 = scmp.ne.s32.totalorder %s698_s10, %s694_s9  ;;  %p768_p1 = scmp.eq.s32.totalorder %s472_s15, 0 }
   0x9   : > { %p772_p2 = scmp.eq.s32.totalorder %s472_s15, 1  ;;  %p111_p3 = scmp.eq.s32.totalorder %s473_s16, 1 }
   0xa   : > { %p778_p4 = por %p768_p1, %p53_p0  ;;  %p474_p5 = scmp.ge.s32.totalorder %s714_s14, 1 }
   0xb   : > { %p783_p6 = por %p111_p3, %p53_p0  ;;  %p118_p7 = scmp.lt.s32.totalorder %s714_s14, 3 }
   0xc   : > { %s912_s19 = scalar_select %p778_p4, 1, 0 }
   0xd   : > { %s913_s20 = scalar_select %p783_p6, 1, 0 }
   0xe   : > { %p788_p8 = pnand %p474_p5, %p118_p7  ;;  %s716_s22 = smov [#allocation5]  }
   0xf   : > { %s134_s23 = sshll.u32 %s716_s22, 4  ;;  %s28_s25 = sadd.s32 1, %s710_s13  ;;  %s135_s23 = int_to_ptr.vmem [resolvable:$true] %s134_s23 }
  0x10   : > { %p501_p10 = pneg %p788_p8  ;;  %s40_s26 = sadd.s32 1, %s702_s11 }
  0x11   : > { %p29_p12 = scmp.ge.s32.totalorder %s28_s25, 2  ;;  %s587_s27 = scalar_lea.vmem %s135_s23, 256 }
  0x12   : > { %p797_p11 = pnand %p501_p10, %p768_p1  ;;  %p588_p0 = scmp.ne.s32.totalorder %s135_s23, %s587_s27 }
  0x13   : > { %p595_p7 = scmp.lt.s32.totalorder %s135_s23, %s135_s23  ;;  %p596_p6 = scmp.lt.s32.totalorder %s587_s27, %s587_s27 }
  0x14   : > { %p578_p13 = pneg %p797_p11 }
  0x15   : > { %p597_p9 = por %p596_p6, %p595_p7 }
  0x16   : > { %p590_p3 = pnand %p588_p0, %p578_p13 }
  0x18   : > { %p591_p5 = pneg %p590_p3 }
  0x1a   : > { %p598_p4 = pnand %p597_p9, %p591_p5 }
  0x1c   : > { %601 = shalt.err (!%p598_p4)
}
  0x1d   : > { %504 = dma.hbm_to_vmem [thread:$0]  (!%p797_p11), %s907_s1, 256, %s135_s23, [#allocation6]  }
  0x1e   : > { %s927_s25 = smov (%p29_p12, %s28_s25), 0  ;;  %p47_p6 = scmp.ne.s32.totalorder %s702_s11, %s698_s10 }
  0x1f   : > { %p48_p4 = scmp.eq.s32.totalorder %s714_s14, 0  ;;  %s35_s30 = ssub.s32 %s710_s13, %s927_s25 }
  0x20   : > { %p514_p9 = scmp.lt.s32.totalorder %s714_s14, 2  ;;  %p38_p10 = scmp.eq.s32.totalorder %s35_s30, 0 }
  0x21   : > { %p49_p13 = por %p48_p4, %p47_p6  ;;  %p820_p0 = por %p772_p2, %p47_p6 }
  0x22   : > { %s145_s4 = sand.u32 1, %s702_s11   ;;  %s491_s7 = sshll.u32 %s710_s13, 9 }
  0x23   : > { %s826_s5 = scalar_select %p38_p10, %s702_s11, %s40_s26  }
  0x24   : > { %s477_s6 = sshll.u32 %s145_s4, 5  ;;  %s157_s16 = scalar_lea.hbm %s906_s0, %s491_s7 }
  0x25   : > { %s149_s22 = scalar_lea.vmem [#allocation2], %s477_s6  ;;  %p832_p11 = pnand %p514_p9, %p49_p13 }
  0x26   : > { %s159_s23 = sshll.u32 %s149_s22, 4  ;;  %s146_s18 = scalar_lea.sflag [#allocation3], %s145_s4  ;;  %s160_s23 = int_to_ptr.vmem [resolvable:$true] %s159_s23 }
  0x27   : > { %p604_p2 = pneg %p832_p11  ;;  %s615_s27 = scalar_lea.vmem %s160_s23, 512 }
  0x28   : > { %p616_p12 = scmp.ne.s32.totalorder %s160_s23, %s615_s27  ;;  %s717_s26 = smov [#allocation2]  }
  0x29   : > { %s620_s28 = sshll.u32 %s717_s26, 4  ;;  %s621_s28 = int_to_ptr.vmem [resolvable:$false] %s620_s28 }
  0x2a   : > { %p618_p3 = pnand %p616_p12, %p604_p2  ;;  %s622_s29 = scalar_lea.vmem %s621_s28, 1024 }
  0x2b   : > { %p623_p7 = scmp.lt.s32.totalorder %s160_s23, %s621_s28  ;;  %p624_p6 = scmp.lt.s32.totalorder %s622_s29, %s615_s27 }
  0x2c   : > { %p619_p5 = pneg %p618_p3 }
  0x2d   : > { %p625_p4 = por %p624_p6, %p623_p7 }
  0x2f   : > { %p626_p10 = pnand %p625_p4, %p619_p5 }
  0x31   : > { %629 = shalt.err (!%p626_p10)
}
  0x32   : > { %508 = dma.hbm_to_vmem [thread:$0]  (!%p832_p11), %s157_s16, 512, %s160_s23, %s146_s18  }
  0x33   : > { %168 = sbr.rel (%p788_p8) target bundleno = 132 (0x84), region = 28  ;;  %s843_s30 = sand.u32 (!%p788_p8), 1, %s698_s10  }
  0x34   : > { %s481_s4 = sshll.u32 (!%p788_p8), %s843_s30, 5  ;;  %s171_s6 = scalar_lea.sflag (!%p788_p8), [#allocation3], %s843_s30 }
  0x35   : > { %s174_s7 = scalar_lea.vmem (!%p788_p8), [#allocation2], %s481_s4  ;;  %p918_p9 = scmp.ne.s32.totalorder (!%p788_p8), %s912_s19, 0 }
  0x38   : > { %681 = dma.done.wait (%p918_p9), %s171_s6, 512  }
  0x39   : > { %683 = vsyncadd (%p918_p9), %s171_s6, 4294966784 }
  0x3a   : > { %685 = dma.done.wait (%p768_p1), [#allocation6], 256  }
  0x3b   : > { %687 = vsyncadd (%p768_p1), [#allocation6], 4294967040  ;;  %v202_v0 = vld [vmem:[%s174_s7] sm:$0xff]  ;;  %v203_v1 = vld [vmem:[%s174_s7 + $0x8] sm:$0xff]  ;;  %s483_s17 = sshll.u32 %s843_s30, 4  ;;  %vm344_vm0 = vcmask 1041408  }
  0x3c   : > { %v238_v2 = vmul.f32 0.2, %v202_v0  ;;  %v239_v3 = vmul.f32 0.2, %v203_v1  ;;  %v204_v4 = vld [vmem:[%s174_s7 + $0x10] sm:$0xff]  ;;  %v205_v5 = vld [vmem:[%s174_s7 + $0x18] sm:$0xff] }
  0x3d   : > { %v240_v8 = vmul.f32 0.2, %v204_v4  ;;  %v241_v9 = vmul.f32 0.2, %v205_v5  ;;  %v206_v10 = vld [vmem:[#allocation5] sm:$0xff]  ;;  %v207_v14 = vld [vmem:[#allocation5 + $0x8] sm:$0xff] }
  0x3e   : > { %v242_v6 = vmul.f32 1.442695, %v238_v2  ;;  %v244_v7 = vmul.f32 1.442695, %v239_v3  ;;  %v214_v13 = vcombine.high %v206_v10, %v206_v10  ;;  %v215_v15 = vcombine.high %v207_v14, %v207_v14  ;;  %s198_s19 = scalar_lea.vmem [#allocation7], %s483_s17  ;;  %s492_s8 = sshll.u32 %s706_s12, 8 }
  0x3f   : > { %v246_v11 = vmul.f32 1.442695, %v240_v8  ;;  %v248_v12 = vmul.f32 1.442695, %v241_v9  ;;  %v208_v16 = vmul.f32 0.1, %v202_v0  ;;  %s374_s22 = scalar_lea.hbm %s908_s2, %s492_s8 }
  0x40   : > { %568 = vpow2.f32 %v242_v6  ;;  %v209_v17 = vmul.f32 0.1, %v203_v1  ;;  %v216_v18 = vrot.slane %v206_v10, 2  ;;  %v217_v19 = vrot.slane %v214_v13, 2  ;;  %s376_s21 = sshll.u32 %s198_s19, 4  ;;  %s360_s23 = scalar_lea.sflag [#allocation4], %s843_s30  ;;  %s861_s21 = int_to_ptr.vmem [resolvable:$true] %s376_s21 }
  0x41   : > { %570 = vpow2.f32 %v244_v7  ;;  %v210_v20 = vmul.f32 0.1, %v204_v4  ;;  %v211_v21 = vmul.f32 0.1, %v205_v5  ;;  %v218_v22 = vrot.slane %v207_v14, 2  ;;  %s630_s24 = scalar_lea.vmem %s861_s21, 256 }
  0x42   : > { %572 = vpow2.f32 %v246_v11  ;;  %v219_v23 = vrot.slane %v215_v15, 2  ;;  %v224_v24 = vmul.f32 %v216_v18, %v208_v16  ;;  %v225_v25 = vmul.f32 %v217_v19, %v209_v17  ;;  %p631_p1 = scmp.ne.s32.totalorder %s861_s21, %s630_s24  ;;  %s718_s12 = smov [#allocation7]  }
  0x43   : > { %574 = vpow2.f32 %v248_v12  ;;  %v226_v28 = vmul.f32 %v218_v22, %v210_v20  ;;  %s634_s18 = sshll.u32 %s718_s12, 4  ;;  %s635_s18 = int_to_ptr.vmem [resolvable:$false] %s634_s18 }
  0x44   : > { %v227_v29 = vmul.f32 %v219_v23, %v211_v21  ;;  %v232_v30 = vcombine.low %v224_v24, %v225_v25  ;;  %p632_p8 = pnand %p631_p1, %p820_p0  ;;  %s636_s27 = scalar_lea.vmem %s635_s18, 512 }
  0x45   : > { %p637_p11 = scmp.lt.s32.totalorder %s861_s21, %s635_s18  ;;  %p638_p2 = scmp.lt.s32.totalorder %s636_s27, %s630_s24 }
  0x46   : > { %v233_v35 = vcombine.low %v226_v28, %v227_v29  ;;  %v236_v37 = vadd.f32 %v232_v30, %v206_v10  ;;  %p633_p13 = pneg %p632_p8 }
  0x47   : > { %p639_p12 = por %p638_p2, %p637_p11 }
  0x48   : > { %v237_v41 = vadd.f32 %v233_v35, %v207_v14 }
  0x49   : > { %p640_p3 = pnand %p639_p12, %p633_p13 }
  0x4d   : > { %v569_v26 = vpop.eup %568 }
  0x4e   : > { %v571_v27 = vpop.eup %570 }
  0x4f   : > { %v254_v31 = vcombine.low %v569_v26, %v571_v27  ;;  %v573_v32 = vpop.eup %572  ;;  %v314_v53 = vcombine.high %v569_v26, %v571_v27 }
  0x50   : > { %v575_v33 = vpop.eup %574 }
  0x51   : > { %v258_v34 = vmul.f32 %v254_v31, %v206_v10  ;;  %v255_v36 = vcombine.low %v573_v32, %v575_v33  ;;  %v315_v60 = vcombine.high %v573_v32, %v575_v33 }
  0x53   : > { %v260_v38 = vmul.f32 0.5, %v258_v34  ;;  %v259_v39 = vmul.f32 %v255_v36, %v207_v14 }
  0x55   : > { %v484_v40 = vrot.slane %v260_v38, 10  ;;  %v261_v42 = vmul.f32 0.5, %v259_v39 }
  0x57   : > { %v270_v43 = vsub.f32 %v236_v37, %v484_v40  ;;  %v485_v44 = vrot.slane %v261_v42, 10 }
  0x59   : > { %v274_v45 = vrot.slane %v270_v43, 6  ;;  %v271_v46 = vsub.f32 %v237_v41, %v485_v44 }
  0x5b   : > { %v278_v47 = vadd.f32 %v274_v45, %v258_v34  ;;  %v275_v48 = vrot.slane %v271_v46, 6 }
  0x5d   : > { %v284_v49 = vsub.f32 %v278_v47, %v274_v45  ;;  %v279_v50 = vadd.f32 %v275_v48, %v259_v39  ;;  %v280_v55 = vadd.f32 %v278_v47, %v274_v45 }
  0x5f   : > { %v288_v51 = vcombine.high %v284_v49, %v284_v49  ;;  %v290_v52 = vrot.slane %v284_v49, 6  ;;  %v285_v54 = vsub.f32 %v279_v50, %v275_v48  ;;  %v318_v62 = vmul.f32 %v314_v53, %v284_v49 }
  0x60   : > { %v281_v63 = vadd.f32 %v279_v50, %v275_v48  ;;  %v282_v2 = vmul.f32 0.5, %v280_v55 }
  0x61   : > { %v291_v56 = vrot.slane %v288_v51, 6  ;;  %v298_v57 = vmul.f32 %v290_v52, %v208_v16  ;;  %v289_v58 = vcombine.high %v285_v54, %v285_v54  ;;  %v292_v59 = vrot.slane %v285_v54, 6 }
  0x62   : > { %v319_v5 = vmul.f32 %v315_v60, %v285_v54  ;;  %v320_v7 = vmul.f32 0.5, %v318_v62  ;;  %v283_v8 = vmul.f32 0.5, %v281_v63 }
  0x63   : > { %v299_v61 = vmul.f32 %v291_v56, %v209_v17  ;;  %v293_v0 = vrot.slane %v289_v58, 6  ;;  %v300_v1 = vmul.f32 %v292_v59, %v210_v20 }
  0x64   : > { %v321_v12 = vmul.f32 0.5, %v319_v5 }
  0x65   : > { %v306_v3 = vcombine.high %v298_v57, %v299_v61  ;;  %v301_v4 = vmul.f32 %v293_v0, %v211_v21 }
  0x67   : > { %v308_v6 = vrot.slane %v306_v3, 6  ;;  %v307_v9 = vcombine.high %v300_v1, %v301_v4 }
  0x69   : > { %v312_v10 = vadd.f32 %v308_v6, %v282_v2  ;;  %v309_v11 = vrot.slane %v307_v9, 6 }
  0x6b   : > { %v322_v13 = vsub.f32 %v312_v10, %v320_v7  ;;  %v313_v14 = vadd.f32 %v309_v11, %v283_v8 }
  0x6d   : > { %v324_v15 = vadd.f32 %v322_v13, %v318_v62  ;;  %v328_v16 = vcombine.high %v322_v13, %v322_v13  ;;  %v330_v17 = vrot.slane %v322_v13, 2  ;;  %v323_v18 = vsub.f32 %v313_v14, %v321_v12 }
  0x6f   : > { %v331_v19 = vrot.slane %v328_v16, 2  ;;  %v340_v20 = vcombine.high %v324_v15, %v324_v15  ;;  %v345_v21 = vsel %vm344_vm0, %v330_v17, %v324_v15  ;;  %v325_v22 = vadd.f32 %v323_v18, %v319_v5 }
  0x70   : > { %v329_v23 = vcombine.high %v323_v18, %v323_v18  ;;  %v332_v24 = vrot.slane %v323_v18, 2 }
  0x71   : > { %v346_v25 = vsel %vm344_vm0, %v331_v19, %v340_v20  ;;  %v341_v28 = vcombine.high %v325_v22, %v325_v22 }
  0x72   : > { %v353_v26 = vcombine.low %v345_v21, %v346_v25  ;;  %v333_v27 = vrot.slane %v329_v23, 2  ;;  %v347_v29 = vsel %vm344_vm0, %v332_v24, %v325_v22 }
  0x74   : > { %357 = vst [vmem:[%s198_s19] sm:$0xff] %v353_v26  ;;  %v348_v30 = vsel %vm344_vm0, %v333_v27, %v341_v28 }
  0x75   : > { %v354_v31 = vcombine.low %v347_v29, %v348_v30 }
  0x77   : > { %358 = vst [vmem:[%s198_s19 + $0x8] sm:$0xff] %v354_v31 }
  0x78   : > { %643 = shalt.err (!%p640_p3)
}
  0x79   : > { %s644_s26 = scalar_lea.hbm %s374_s22, 256  ;;  %s648_s30 = scalar_lea.hbm %s908_s2, 512 }
  0x7a   : > { %p645_p5 = scmp.ne.s32.totalorder %s374_s22, %s644_s26  ;;  %p649_p4 = scmp.lt.s32.totalorder %s374_s22, %s908_s2 }
  0x7b   : > { %p650_p10 = scmp.lt.s32.totalorder %s648_s30, %s644_s26 }
  0x7c   : > { %p646_p7 = pnand %p645_p5, %p820_p0 }
  0x7d   : > { %p651_p9 = por %p650_p10, %p649_p4 }
  0x7e   : > { %p647_p6 = pneg %p646_p7 }
  0x80   : > { %p652_p1 = pnand %p651_p9, %p647_p6 }
  0x82   : > { %655 = shalt.err (!%p652_p1)
}
  0x83   : > { %499 = dma.vmem_to_hbm [thread:$0]  (%p820_p0), %s861_s21, 256, %s374_s22, %s360_s23  }
  0x84 PF: > { %s388_s7 = sand.u32 1, %s694_s9   ;;  %p919_p8 = scmp.ne.s32.totalorder %s913_s20, 0 }
  0x85   : > { %p920_p13 = scmp.ge.s32.totalorder %s714_s14, 2  ;;  %s389_s17 = scalar_lea.sflag [#allocation4], %s388_s7 }
  0x87   : > { %p510_p11 = pnand %p920_p13, %p919_p8 }
  0x89   : > { %p511_p2 = pneg %p510_p11 }
  0x8b   : > { %689 = dma.done.wait (%p511_p2), %s389_s17, 256  }
  0x8c   : > { %691 = vsyncadd (%p511_p2), %s389_s17, 4294967040  ;;  %s19_s14 = sadd.s32 1, %s714_s14   ;;  %s921_s9 = smov %s698_s10 }
  0x8d   : > { %p16_p12 = scmp.ge.s32.totalorder %s19_s14, 4   ;;  %s922_s10 = smov %s702_s11 }
  0x8e   : > { %s923_s11 = smov %s826_s5  ;;  %s924_s12 = smov %s710_s13 }
  0x8f   : > { %s925_s13 = smov %s927_s25  ;;  %18 = sbr.rel (!%p16_p12) target bundleno = 7 (0x7), region = 78 }
  0x94   :  { %394 = vsyncpa [#allocation3], 1 }
  0x95   :  { %396 = vsyncpa [#allocation3 + $0x1], 1 }
  0x96   :  { %397 = vsyncpa [#allocation6], 1 }
  0x97   :  { %398 = vsyncpa [#allocation4], 1 }
  0x98   :  { %400 = vsyncpa [#allocation4 + $0x1], 1 }

</bundles_post_ra>
